<compile_context>
chip_gen: v6e
topology: v6e:2x2x1
jax: 0.10.0
libtpu: 0.0.40
codegen_flags: <defaults>
</compile_context>

<pallas_src>
import math

import jax
import jax.numpy as jnp
import numpy as np
from jax.experimental import pallas as pl
from jax.experimental.pallas import tpu as pltpu


# ---------------- Fused Pallas kernel ----------------

def fused_conv_conv1d_sigmoid_kernel(p1_ref, w1_ref, m_ref, b2_ref, o_ref):
    # p1_ref: (C_in*KH*KW + 1, H*W)  im2col patches of x with a trailing ones row
    #                                 (conv1 bias folded into the matmul)
    # w1_ref: (C_out1, C_in*KH*KW + 1) conv1 weights with bias column appended
    # m_ref : (C_out1*W, W)           banded matrix encoding Conv1d(k=3, pad=1) as a
    #                                 single matmul over the flattened conv1 output
    # b2_ref: (1,) in SMEM            conv2 bias (scalar)
    # o_ref : (N=32, L=16)            sigmoid(conv2(conv1(x)))
    v1 = jnp.dot(w1_ref[...], p1_ref[...],
                 preferred_element_type=jnp.float32)          # (32, 512) stays in VMEM
    z = jnp.dot(v1, m_ref[...],
                preferred_element_type=jnp.float32) + b2_ref[0]  # (32, 16)
    o_ref[...] = 1.0 / (1.0 + jnp.exp(-z))                    # exp -> EUP, fused sigmoid


# ---------------- Model forward (layout glue in JAX, all compute in Pallas) ----------------

def model_forward(x, w1, b1, w2, b2):
    C, H, W = x.shape                       # (3, 32, 16)
    Cout = w1.shape[0]                      # 32
    KH = KW = 3
    C1d = w2.shape[1]                       # 32 (must equal H for the chain to be valid)
    K1d = w2.shape[2]                       # 3

    # ---- im2col for conv1 (pure layout glue; the matmul runs inside the kernel) ----
    xpad = jnp.pad(x, ((0, 0), (1, 1), (1, 1)))
    patches = jnp.stack(
        [xpad[:, i:i + H, j:j + W] for i in range(KH) for j in range(KW)], axis=1
    )                                                   # (C, 9, H, W)
    P1 = patches.reshape(C * KH * KW, H * W)            # (27, 512)
    # fold conv1 bias into the matmul: ones row in P1, bias column in W1
    P1a = jnp.concatenate([P1, jnp.ones((1, H * W), jnp.float32)], axis=0)       # (28, 512)
    W1a = jnp.concatenate([w1.reshape(Cout, C * KH * KW), b1[:, None]], axis=1)  # (32, 28)

    # ---- fold the Conv1d (C1d -> 1, k=3, pad=1) into one banded matrix M (512, 16) ----
    # In-kernel, conv1's output stays flattened as v1[n, c*W + l] (n = conv1 out-chan,
    # c = H index = Conv1d channel, l = W index = Conv1d position).  Then
    #   out[n, l] = b2 + sum_{c,m} v1[n, c*W + m] * M[c*W + m, l]
    # with M[c*W + m, l] = w2[0, c, m - l + pad] when 0 <= m - l + pad < K (else 0).
    w2_2d = w2.reshape(C1d, K1d)                                   # (32, 3)
    d = jnp.arange(W)[:, None] - jnp.arange(W)[None, :] + (K1d // 2)   # (16, 16)
    valid = (d >= 0) & (d < K1d)
    M = jnp.where(valid[None, :, :], w2_2d[:, jnp.clip(d, 0, K1d - 1)], 0.0)  # (32, 16, 16)
    M = M.reshape(C1d * W, W)                                      # (512, 16)

    out = pl.pallas_call(
        fused_conv_conv1d_sigmoid_kernel,
        out_shape=jax.ShapeDtypeStruct((Cout, W), jnp.float32),
        in_specs=[
            pl.BlockSpec(memory_space=pltpu.MemorySpace.VMEM),     # P1a (28, 512)
            pl.BlockSpec(memory_space=pltpu.MemorySpace.VMEM),     # W1a (32, 28)
            pl.BlockSpec(memory_space=pltpu.MemorySpace.VMEM),     # M   (512, 16)
            pl.BlockSpec(memory_space=pltpu.MemorySpace.SMEM),     # b2  (1,) scalar
        ],
        out_specs=pl.BlockSpec(memory_space=pltpu.MemorySpace.VMEM),
    )(P1a, W1a, M, b2)

    return out.reshape(Cout, 1, W)          # (32, 1, 16) — PyTorch Conv1d output layout


# ---------------- Pure-JAX reference for validation ----------------

def ref_forward(x, w1, b1, w2, b2):
    v1 = jax.lax.conv_general_dilated(
        x[None], w1, (1, 1), "SAME",
        dimension_numbers=("NCHW", "OIHW", "NCHW"),
    )[0] + b1[:, None, None]
    v2 = jax.lax.conv_general_dilated(
        v1, w2, (1,), "SAME",
        dimension_numbers=("NCH", "OIH", "NCH"),
    ) + b2[None, :, None]
    return jax.nn.sigmoid(v2)


if __name__ == "__main__":
    key = jax.random.PRNGKey(0)
    k1, k2, k3, k4, kx = jax.random.split(key, 5)

    # Deterministic parameter init (PyTorch-style uniform(-1/sqrt(fan_in), +1/sqrt(fan_in)))
    fan1 = 3 * 3 * 3
    w1 = jax.random.uniform(k1, (32, 3, 3, 3), jnp.float32, -1.0, 1.0) / math.sqrt(fan1)
    b1 = jax.random.uniform(k2, (32,), jnp.float32, -1.0, 1.0) / math.sqrt(fan1)
    fan2 = 32 * 3
    w2 = jax.random.uniform(k3, (1, 32, 3), jnp.float32, -1.0, 1.0) / math.sqrt(fan2)
    b2 = jax.random.uniform(k4, (1,), jnp.float32, -1.0, 1.0) / math.sqrt(fan2)

    # Input: unbatched CHW, H must equal 32 for the Conv2d->Conv1d chain to be valid.
    x = jax.random.normal(kx, (3, 32, 16), jnp.float32)

    out = jax.jit(model_forward)(x, w1, b1, w2, b2)
    out = jax.block_until_ready(out)

    ref = jax.block_until_ready(ref_forward(x, w1, b1, w2, b2))
    assert out.shape == (32, 1, 16), out.shape
    assert np.allclose(np.asarray(out), np.asarray(ref), rtol=1e-2, atol=1e-3), (
        np.max(np.abs(np.asarray(out) - np.asarray(ref)))
    )

    print("KERNEL_OK")
</pallas_src>

<mosaic_0001>
module attributes {stable_mosaic.version = 11 : i64} {
  func.func @fused_conv_conv1d_sigmoid_kernel(%arg0: memref<28x512xf32, #tpu.memory_space<vmem>>, %arg1: memref<32x28xf32, #tpu.memory_space<vmem>>, %arg2: memref<512x16xf32, #tpu.memory_space<vmem>>, %arg3: memref<1xf32, #tpu.memory_space<smem>>, %arg4: memref<32x16xf32, #tpu.memory_space<vmem>>) attributes {dimension_semantics = [], scalar_prefetch = 0 : i64, scratch_operands = 0 : i64, tpu.core_type = #tpu.core_type<tc>} {
    %c0 = arith.constant 0 : index
    %c0_0 = arith.constant 0 : index
    %0 = vector.load %arg1[%c0, %c0_0] : memref<32x28xf32, #tpu.memory_space<vmem>>, vector<32x28xf32>
    %c0_1 = arith.constant 0 : index
    %c0_2 = arith.constant 0 : index
    %1 = vector.load %arg0[%c0_1, %c0_2] : memref<28x512xf32, #tpu.memory_space<vmem>>, vector<28x512xf32>
    %cst = arith.constant dense<0.000000e+00> : vector<32x512xf32>
    %2 = tpu.matmul %0, %1, %cst {dimension_numbers = #tpu.dot_dimension_numbers<[1], [0], [0], [1], [0, 0, 1, 1], [], []>} : vector<32x28xf32>, vector<28x512xf32>, vector<32x512xf32> -> vector<32x512xf32>
    %c0_3 = arith.constant 0 : index
    %c0_4 = arith.constant 0 : index
    %3 = vector.load %arg2[%c0_3, %c0_4] : memref<512x16xf32, #tpu.memory_space<vmem>>, vector<512x16xf32>
    %cst_5 = arith.constant dense<0.000000e+00> : vector<32x16xf32>
    %4 = tpu.matmul %2, %3, %cst_5 {dimension_numbers = #tpu.dot_dimension_numbers<[1], [0], [0], [1], [0, 0, 1, 1], [], []>} : vector<32x512xf32>, vector<512x16xf32>, vector<32x16xf32> -> vector<32x16xf32>
    %c0_6 = arith.constant 0 : index
    %5 = memref.load %arg3[%c0_6] : memref<1xf32, #tpu.memory_space<smem>>
    %6 = vector.broadcast %5 : f32 to vector<32x16xf32>
    %7 = arith.addf %4, %6 : vector<32x16xf32>
    %cst_7 = arith.constant 0.000000e+00 : f32
    %8 = vector.broadcast %cst_7 : f32 to vector<32x16xf32>
    %9 = arith.subf %8, %7 : vector<32x16xf32>
    %10 = math.exp %9 : vector<32x16xf32>
    %cst_8 = arith.constant 1.000000e+00 : f32
    %11 = vector.broadcast %cst_8 : f32 to vector<32x16xf32>
    %12 = arith.addf %11, %10 : vector<32x16xf32>
    %cst_9 = arith.constant 1.000000e+00 : f32
    %13 = vector.broadcast %cst_9 : f32 to vector<32x16xf32>
    %14 = arith.divf %13, %12 : vector<32x16xf32>
    %c0_10 = arith.constant 0 : index
    %c0_11 = arith.constant 0 : index
    %15 = vector.load %arg4[%c0_10, %c0_11] : memref<32x16xf32, #tpu.memory_space<vmem>>, vector<32x16xf32>
    tpu.vector_store %arg4[%c0_10, %c0_11], %14 {strides = array<i32>} : memref<32x16xf32, #tpu.memory_space<vmem>>, vector<32x16xf32>,
    return
  }
}

</mosaic_0001>

<bundles_post_ra>
// kernel: model_forward.1
= control target key start
LH: loop header
LB: loop body
LE: loop exit
PB: predicated region body
PF: predicated region fallthrough
CT: control target
= control target key end

     0   :  { %vm51_vm0 = vcmask 1043456   ;;  %v628_v3 = vmov 0.0   ;;  %vm38_vm1 = vcmask 228352   ;;  %vm502_vm2 = vcmask 130048   ;;  %s937_s0 = inlined_call_operand.vmem [shape: f32[28,512], index: 0, kind: input, shape index: {}]   ;;  %s938_s1 = inlined_call_operand.vmem [shape: f32[32,28], index: 1, kind: input, shape index: {}]   ;;  %s939_s2 = inlined_call_operand.vmem [shape: f32[512,16], index: 2, kind: input, shape index: {}]   ;;  %s940_s3 = inlined_call_operand.<no memory space> [shape: f32[1], index: 3, kind: input, shape index: {}]   ;;  %s941_s4 = inlined_call_operand.vmem [shape: f32[32,16], index: 4, kind: output, shape index: {}]  }
   0x1   :  { %v35_v0 = vld [vmem:[%s937_s0 + $0x68] sm:$0xf]  ;;  %v37_v1 = vld [vmem:[%s937_s0 + $0x78] sm:$0xf]  ;;  %v34_v2 = vld [vmem:[%s937_s0 + $0x60] sm:$0xf]  ;;  %128 = vmatprep.mubr.f32.mxu0 %v628_v3  ;;  %217 = vmatprep.mubr.f32.mxu1 %v628_v3 }
   0x2   :  { %511 = vmatprep.subr.msk.mxu0 %vm51_vm0, %v35_v0  ;;  %517 = vmatprep.subr.msk.mxu1 %vm51_vm0, %v37_v1  ;;  %v36_v4 = vld [vmem:[%s937_s0 + $0x70] sm:$0xf]  ;;  %v31_v5 = vld [vmem:[%s937_s0 + $0x48] sm:$0xff]  ;;  %v33_v6 = vld [vmem:[%s937_s0 + $0x58] sm:$0xff] }
   0x3   :  { %512 = vmatpush1.msk.msra.mxu0 %vm51_vm0, %v34_v2  ;;  %518 = vmatpush1.msk.msra.mxu1 %vm51_vm0, %v36_v4  ;;  %v30_v7 = vld [vmem:[%s937_s0 + $0x40] sm:$0xff]  ;;  %v32_v8 = vld [vmem:[%s937_s0 + $0x50] sm:$0xff]  ;;  %v27_v9 = vld [vmem:[%s937_s0 + $0x28] sm:$0xff] }
   0x4   :  { %90 = vmatprep.subr.mxu0 %v31_v5  ;;  %179 = vmatprep.subr.mxu1 %v33_v6  ;;  %v29_v10 = vld [vmem:[%s937_s0 + $0x38] sm:$0xff]  ;;  %v26_v11 = vld [vmem:[%s937_s0 + $0x20] sm:$0xff]  ;;  %v28_v12 = vld [vmem:[%s937_s0 + $0x30] sm:$0xff] }
   0x5   :  { %91 = vmatpush1.msra.mxu0 %v30_v7  ;;  %180 = vmatpush1.msra.mxu1 %v32_v8  ;;  %v23_v13 = vld [vmem:[%s937_s0 + $0x8] sm:$0xff]  ;;  %v25_v14 = vld [vmem:[%s937_s0 + $0x18] sm:$0xff]  ;;  %v22_v15 = vld [vmem:[%s937_s0] sm:$0xff] }
   0x6   :  { %92 = vmatprep.subr.mxu0 %v27_v9  ;;  %181 = vmatprep.subr.mxu1 %v29_v10  ;;  %v24_v16 = vld [vmem:[%s937_s0 + $0x10] sm:$0xff]  ;;  %v18_v17 = vld [vmem:[%s938_s1] sm:$0xff]  ;;  %v273_v18 = vld [vmem:[%s939_s2 + $0xf8] sm:$0xff] }
   0x7   :  { %93 = vmatpush1.msra.mxu0 %v26_v11  ;;  %182 = vmatpush1.msra.mxu1 %v28_v12  ;;  %v305_v19 = vld [vmem:[%s939_s2 + $0x1f8] sm:$0xff]  ;;  %v19_v22 = vld [vmem:[%s938_s1 + $0x8] sm:$0xff]  ;;  %v272_v23 = vld [vmem:[%s939_s2 + $0xf0] sm:$0xff] }
   0x8   :  { %94 = vmatprep.subr.mxu0 %v23_v13  ;;  %183 = vmatprep.subr.mxu1 %v25_v14  ;;  %v257_v20 = vld [vmem:[%s939_s2 + $0x78] sm:$0xff]  ;;  %v304_v24 = vld [vmem:[%s939_s2 + $0x1f0] sm:$0xff]  ;;  %v271_v28 = vld [vmem:[%s939_s2 + $0xe8] sm:$0xff] }
   0x9   :  { %95 = vmatpush1.msra.mxu0 %v22_v15  ;;  %184 = vmatpush1.msra.mxu1 %v24_v16  ;;  %v289_v21 = vld [vmem:[%s939_s2 + $0x178] sm:$0xff]  ;;  %v256_v25 = vld [vmem:[%s939_s2 + $0x70] sm:$0xff]  ;;  %v303_v29 = vld [vmem:[%s939_s2 + $0x1e8] sm:$0xff] }
   0xa   :  { %513 = vmatmul.mubr.msk.f32.vlgmr.msra.gmra.mxu0 %vm38_vm1, %v18_v17  ;;  %519 = vmatmul.mubr.msk.f32.vlgmr.msra.gmra.mxu1 %vm38_vm1, %v18_v17  ;;  %v288_v26 = vld [vmem:[%s939_s2 + $0x170] sm:$0xff]  ;;  %v255_v30 = vld [vmem:[%s939_s2 + $0x68] sm:$0xff]  ;;  %v21_v32 = vld [vmem:[%s938_s1 + $0x18] sm:$0xff] }
   0xb   :  { %134 = vmatprep.mubr.f32.mxu0 %v628_v3  ;;  %223 = vmatprep.mubr.f32.mxu1 %v628_v3  ;;  %v20_v27 = vld [vmem:[%s938_s1 + $0x10] sm:$0xff]  ;;  %v287_v31 = vld [vmem:[%s939_s2 + $0x168] sm:$0xff]  ;;  %v270_v33 = vld [vmem:[%s939_s2 + $0xe0] sm:$0xff] }
   0xc   :  { %523 = vmatprep.subr.mxu0 %v273_v18  ;;  %567 = vmatprep.subr.mxu1 %v305_v19  ;;  %v302_v34 = vld [vmem:[%s939_s2 + $0x1e0] sm:$0xff]  ;;  %v269_v37 = vld [vmem:[%s939_s2 + $0xd8] sm:$0xff]  ;;  %v268_v41 = vld [vmem:[%s939_s2 + $0xd0] sm:$0xff] }
   0xd   :  { %524 = vmatpush3.msra.mxu0 %v257_v20  ;;  %568 = vmatpush3.msra.mxu1 %v289_v21  ;;  %v254_v35 = vld [vmem:[%s939_s2 + $0x60] sm:$0xff]  ;;  %v301_v38 = vld [vmem:[%s939_s2 + $0x1d8] sm:$0xff]  ;;  %v300_v42 = vld [vmem:[%s939_s2 + $0x1d0] sm:$0xff] }
   0xe   :  { %514 = vmatmul.mubr.msk.f32.gmra.mxu0 %vm38_vm1, %v19_v22  ;;  %520 = vmatmul.mubr.msk.f32.gmra.mxu1 %vm38_vm1, %v19_v22  ;;  %v286_v36 = vld [vmem:[%s939_s2 + $0x160] sm:$0xff]  ;;  %v253_v39 = vld [vmem:[%s939_s2 + $0x58] sm:$0xff]  ;;  %v252_v43 = vld [vmem:[%s939_s2 + $0x50] sm:$0xff] }
   0xf   :  { %140 = vmatprep.mubr.f32.mxu0 %v628_v3  ;;  %229 = vmatprep.mubr.f32.mxu1 %v628_v3  ;;  %v285_v40 = vld [vmem:[%s939_s2 + $0x158] sm:$0xff]  ;;  %v284_v44 = vld [vmem:[%s939_s2 + $0x150] sm:$0xff]  ;;  %v267_v45 = vld [vmem:[%s939_s2 + $0xc8] sm:$0xff] }
  0x10   :  { %525 = vmatprep.subr.mxu0 %v272_v23  ;;  %569 = vmatprep.subr.mxu1 %v304_v24  ;;  %v299_v46 = vld [vmem:[%s939_s2 + $0x1c8] sm:$0xff]  ;;  %v266_v49 = vld [vmem:[%s939_s2 + $0xc0] sm:$0xff]  ;;  %v265_v53 = vld [vmem:[%s939_s2 + $0xb8] sm:$0xff] }
  0x11   :  { %526 = vmatpush3.msra.mxu0 %v256_v25  ;;  %570 = vmatpush3.msra.mxu1 %v288_v26  ;;  %v251_v47 = vld [vmem:[%s939_s2 + $0x48] sm:$0xff]  ;;  %v298_v50 = vld [vmem:[%s939_s2 + $0x1c0] sm:$0xff]  ;;  %v297_v54 = vld [vmem:[%s939_s2 + $0x1b8] sm:$0xff] }
  0x12   :  { %515 = vmatmul.mubr.msk.f32.gmra.mxu0 %vm38_vm1, %v20_v27  ;;  %521 = vmatmul.mubr.msk.f32.gmra.mxu1 %vm38_vm1, %v20_v27  ;;  %v283_v48 = vld [vmem:[%s939_s2 + $0x148] sm:$0xff]  ;;  %v250_v51 = vld [vmem:[%s939_s2 + $0x40] sm:$0xff]  ;;  %v249_v55 = vld [vmem:[%s939_s2 + $0x38] sm:$0xff] }
  0x13   :  { %146 = vmatprep.mubr.f32.mxu0 %v628_v3  ;;  %235 = vmatprep.mubr.f32.mxu1 %v628_v3  ;;  %v282_v52 = vld [vmem:[%s939_s2 + $0x140] sm:$0xff]  ;;  %v281_v56 = vld [vmem:[%s939_s2 + $0x138] sm:$0xff]  ;;  %v264_v57 = vld [vmem:[%s939_s2 + $0xb0] sm:$0xff] }
  0x14   :  { %527 = vmatprep.subr.mxu0 %v271_v28  ;;  %571 = vmatprep.subr.mxu1 %v303_v29  ;;  %v296_v58 = vld [vmem:[%s939_s2 + $0x1b0] sm:$0xff]  ;;  %v263_v61 = vld [vmem:[%s939_s2 + $0xa8] sm:$0xff]  ;;  %v262_v1 = vld [vmem:[%s939_s2 + $0xa0] sm:$0xff] }
  0x15   :  { %528 = vmatpush3.msra.mxu0 %v255_v30  ;;  %572 = vmatpush3.msra.mxu1 %v287_v31  ;;  %v248_v59 = vld [vmem:[%s939_s2 + $0x30] sm:$0xff]  ;;  %v295_v62 = vld [vmem:[%s939_s2 + $0x1a8] sm:$0xff]  ;;  %v294_v2 = vld [vmem:[%s939_s2 + $0x1a0] sm:$0xff] }
  0x16   :  { %516 = vmatmul.mubr.msk.f32.gmra.mxu0 %vm38_vm1, %v21_v32  ;;  %522 = vmatmul.mubr.msk.f32.gmra.mxu1 %vm38_vm1, %v21_v32  ;;  %v280_v60 = vld [vmem:[%s939_s2 + $0x130] sm:$0xff]  ;;  %v247_v63 = vld [vmem:[%s939_s2 + $0x28] sm:$0xff]  ;;  %v246_v3 = vld [vmem:[%s939_s2 + $0x20] sm:$0xff] }
  0x17   :  { %529 = vmatprep.subr.mxu0 %v270_v33  ;;  %573 = vmatprep.subr.mxu1 %v302_v34  ;;  %v279_v0 = vld [vmem:[%s939_s2 + $0x128] sm:$0xff]  ;;  %v278_v4 = vld [vmem:[%s939_s2 + $0x120] sm:$0xff]  ;;  %v261_v5 = vld [vmem:[%s939_s2 + $0x98] sm:$0xff] }
  0x18   :  { %530 = vmatpush3.msra.mxu0 %v254_v35  ;;  %574 = vmatpush3.msra.mxu1 %v286_v36  ;;  %v293_v6 = vld [vmem:[%s939_s2 + $0x198] sm:$0xff]  ;;  %v260_v9 = vld [vmem:[%s939_s2 + $0x90] sm:$0xff]  ;;  %v259_v13 = vld [vmem:[%s939_s2 + $0x88] sm:$0xff] }
  0x19   :  { %531 = vmatprep.subr.mxu0 %v269_v37  ;;  %575 = vmatprep.subr.mxu1 %v301_v38  ;;  %v245_v7 = vld [vmem:[%s939_s2 + $0x18] sm:$0xff]  ;;  %v292_v10 = vld [vmem:[%s939_s2 + $0x190] sm:$0xff]  ;;  %v291_v14 = vld [vmem:[%s939_s2 + $0x188] sm:$0xff] }
  0x1a   :  { %532 = vmatpush3.msra.mxu0 %v253_v39  ;;  %576 = vmatpush3.msra.mxu1 %v285_v40  ;;  %v277_v8 = vld [vmem:[%s939_s2 + $0x118] sm:$0xff]  ;;  %v244_v11 = vld [vmem:[%s939_s2 + $0x10] sm:$0xff]  ;;  %v243_v15 = vld [vmem:[%s939_s2 + $0x8] sm:$0xff]  ;;  %v307_v39 = vstv %s940_s3 }
  0x1b   :  { %533 = vmatprep.subr.mxu0 %v268_v41  ;;  %577 = vmatprep.subr.mxu1 %v300_v42  ;;  %v276_v12 = vld [vmem:[%s939_s2 + $0x110] sm:$0xff]  ;;  %v275_v16 = vld [vmem:[%s939_s2 + $0x108] sm:$0xff]  ;;  %v258_v17 = vld [vmem:[%s939_s2 + $0x80] sm:$0xff] }
  0x1c   :  { %534 = vmatpush3.msra.mxu0 %v252_v43  ;;  %578 = vmatpush3.msra.mxu1 %v284_v44  ;;  %v290_v18 = vld [vmem:[%s939_s2 + $0x180] sm:$0xff] }
  0x1d   :  { %535 = vmatprep.subr.mxu0 %v267_v45  ;;  %579 = vmatprep.subr.mxu1 %v299_v46  ;;  %v242_v19 = vld [vmem:[%s939_s2] sm:$0xff] }
  0x1e   :  { %536 = vmatpush3.msra.mxu0 %v251_v47  ;;  %580 = vmatpush3.msra.mxu1 %v283_v48  ;;  %v274_v20 = vld [vmem:[%s939_s2 + $0x100] sm:$0xff] }
  0x1f   :  { %537 = vmatprep.subr.mxu0 %v266_v49  ;;  %581 = vmatprep.subr.mxu1 %v298_v50 }
  0x20   :  { %538 = vmatpush3.msra.mxu0 %v250_v51  ;;  %582 = vmatpush3.msra.mxu1 %v282_v52 }
  0x21   :  { %539 = vmatprep.subr.mxu0 %v265_v53  ;;  %583 = vmatprep.subr.mxu1 %v297_v54 }
  0x22   :  { %540 = vmatpush3.msra.mxu0 %v249_v55  ;;  %584 = vmatpush3.msra.mxu1 %v281_v56 }
  0x23   :  { %541 = vmatprep.subr.mxu0 %v264_v57  ;;  %585 = vmatprep.subr.mxu1 %v296_v58 }
  0x24   :  { %542 = vmatpush3.msra.mxu0 %v248_v59  ;;  %586 = vmatpush3.msra.mxu1 %v280_v60 }
  0x25   :  { %543 = vmatprep.subr.mxu0 %v263_v61  ;;  %587 = vmatprep.subr.mxu1 %v295_v62 }
  0x26   :  { %544 = vmatpush3.msra.mxu0 %v247_v63  ;;  %588 = vmatpush3.msra.mxu1 %v279_v0 }
  0x27   :  { %545 = vmatprep.subr.mxu0 %v262_v1  ;;  %589 = vmatprep.subr.mxu1 %v294_v2 }
  0x28   :  { %546 = vmatpush3.msra.mxu0 %v246_v3  ;;  %590 = vmatpush3.msra.mxu1 %v278_v4 }
  0x29   :  { %547 = vmatprep.subr.mxu0 %v261_v5  ;;  %591 = vmatprep.subr.mxu1 %v293_v6 }
  0x2a   :  { %548 = vmatpush3.msra.mxu0 %v245_v7  ;;  %592 = vmatpush3.msra.mxu1 %v277_v8 }
  0x2b   :  { %549 = vmatprep.subr.mxu0 %v260_v9  ;;  %593 = vmatprep.subr.mxu1 %v292_v10 }
  0x2c   :  { %550 = vmatpush3.msra.mxu0 %v244_v11  ;;  %594 = vmatpush3.msra.mxu1 %v276_v12 }
  0x2d   :  { %551 = vmatprep.subr.mxu0 %v259_v13  ;;  %595 = vmatprep.subr.mxu1 %v291_v14 }
  0x2e   :  { %552 = vmatpush3.msra.mxu0 %v243_v15  ;;  %596 = vmatpush3.msra.mxu1 %v275_v16 }
  0x2f   :  { %553 = vmatprep.subr.mxu0 %v258_v17  ;;  %597 = vmatprep.subr.mxu1 %v290_v18 }
  0x30   :  { %554 = vmatpush3.msra.mxu0 %v242_v19  ;;  %598 = vmatpush3.msra.mxu1 %v274_v20 }
  0xca   :  { %v130_v21 = vpop.f32.mrf.mxu0  ;;  %v219_v22 = vpop.f32.mrf.mxu1 }
  0xcc   :  { %v132_v23 = vpop.f32.mrf.mxu0  ;;  %v221_v24 = vpop.f32.mrf.mxu1 }
  0xcd   :  { %372 = vmatprep.mubr.f32.mxu0 %v132_v23  ;;  %457 = vmatprep.mubr.f32.mxu1 %v221_v24 }
  0xce   :  { %v136_v25 = vpop.f32.mrf.mxu0  ;;  %v225_v26 = vpop.f32.mrf.mxu1  ;;  %373 = vmatmul.mubr.f32.vlgmr.msra.gmra.mxu0 %v130_v21  ;;  %458 = vmatmul.mubr.f32.vlgmr.msra.gmra.mxu1 %v219_v22 }
  0xd0   :  { %v138_v27 = vpop.f32.mrf.mxu0  ;;  %v227_v28 = vpop.f32.mrf.mxu1 }
  0xd1   :  { %377 = vmatprep.mubr.f32.mxu0 %v138_v27  ;;  %462 = vmatprep.mubr.f32.mxu1 %v227_v28 }
  0xd2   :  { %v142_v29 = vpop.f32.mrf.mxu0  ;;  %v231_v30 = vpop.f32.mrf.mxu1  ;;  %378 = vmatmul.mubr.f32.gmra.mxu0 %v136_v25  ;;  %463 = vmatmul.mubr.f32.gmra.mxu1 %v225_v26 }
  0xd4   :  { %v144_v31 = vpop.f32.mrf.mxu0  ;;  %v233_v32 = vpop.f32.mrf.mxu1 }
  0xd5   :  { %382 = vmatprep.mubr.f32.mxu0 %v144_v31  ;;  %467 = vmatprep.mubr.f32.mxu1 %v233_v32 }
  0xd6   :  { %v148_v33 = vpop.f32.mrf.mxu0  ;;  %v237_v34 = vpop.f32.mrf.mxu1  ;;  %383 = vmatmul.mubr.f32.gmra.mxu0 %v142_v29  ;;  %468 = vmatmul.mubr.f32.gmra.mxu1 %v231_v30 }
  0xd8   :  { %v150_v35 = vpop.f32.mrf.mxu0  ;;  %v239_v36 = vpop.f32.mrf.mxu1 }
  0xd9   :  { %387 = vmatprep.mubr.f32.mxu0 %v150_v35  ;;  %472 = vmatprep.mubr.f32.mxu1 %v239_v36 }
  0xda   :  { %388 = vmatmul.mubr.f32.gmra.mxu0 %v148_v33  ;;  %473 = vmatmul.mubr.f32.gmra.mxu1 %v237_v34 }
 0x18e   :  { %v555_v37 = vpop.f32.mrf.mxu0  ;;  %v599_v38 = vpop.f32.mrf.mxu1 }
 0x190   :  { %v556_v40 = vpop.f32.mrf.mxu0  ;;  %v600_v41 = vpop.f32.mrf.mxu1 }
 0x191   :  { %v557_v42 = vadd.f32 %v556_v40, %v555_v37  ;;  %v601_v46 = vadd.f32 %v600_v41, %v599_v38 }
 0x192   :  { %v558_v43 = vpop.f32.mrf.mxu0  ;;  %v602_v44 = vpop.f32.mrf.mxu1 }
 0x193   :  { %v375_v45 = vadd.f32 %v557_v42, %v307_v39 }
 0x194   :  { %v559_v47 = vpop.f32.mrf.mxu0  ;;  %v603_v48 = vpop.f32.mrf.mxu1 }
 0x195   :  { %v460_v49 = vadd.f32 %v601_v46, %v375_v45  ;;  %v560_v50 = vadd.f32 %v559_v47, %v558_v43  ;;  %v604_v55 = vadd.f32 %v603_v48, %v602_v44 }
 0x196   :  { %v561_v51 = vpop.f32.mrf.mxu0  ;;  %v605_v52 = vpop.f32.mrf.mxu1 }
 0x197   :  { %v478_v53 = vsub.f32 0.0, %v460_v49  ;;  %v380_v54 = vadd.f32 %v560_v50, %v307_v39 }
 0x198   :  { %v562_v56 = vpop.f32.mrf.mxu0  ;;  %v606_v57 = vpop.f32.mrf.mxu1 }
 0x199   :  { %v482_v58 = vmul.f32 1.442695, %v478_v53  ;;  %v465_v59 = vadd.f32 %v604_v55, %v380_v54  ;;  %v563_v60 = vadd.f32 %v562_v56, %v561_v51  ;;  %v607_v1 = vadd.f32 %v606_v57, %v605_v52 }
 0x19a   :  { %v564_v61 = vpop.f32.mrf.mxu0  ;;  %v608_v62 = vpop.f32.mrf.mxu1 }
 0x19b   :  { %612 = vpow2.f32 %v482_v58  ;;  %v479_v63 = vsub.f32 0.0, %v465_v59  ;;  %v385_v0 = vadd.f32 %v563_v60, %v307_v39 }
 0x19c   :  { %v565_v2 = vpop.f32.mrf.mxu0  ;;  %v609_v3 = vpop.f32.mrf.mxu1 }
 0x19d   :  { %v484_v4 = vmul.f32 1.442695, %v479_v63  ;;  %v470_v5 = vadd.f32 %v607_v1, %v385_v0  ;;  %v566_v6 = vadd.f32 %v565_v2, %v564_v61  ;;  %v610_v9 = vadd.f32 %v609_v3, %v608_v62 }
 0x19f   :  { %614 = vpow2.f32 %v484_v4  ;;  %v480_v7 = vsub.f32 0.0, %v470_v5  ;;  %v390_v8 = vadd.f32 %v566_v6, %v307_v39 }
 0x1a1   :  { %v486_v10 = vmul.f32 1.442695, %v480_v7  ;;  %v475_v11 = vadd.f32 %v610_v9, %v390_v8 }
 0x1a3   :  { %616 = vpow2.f32 %v486_v10  ;;  %v481_v12 = vsub.f32 0.0, %v475_v11 }
 0x1a5   :  { %v488_v13 = vmul.f32 1.442695, %v481_v12 }
 0x1a7   :  { %618 = vpow2.f32 %v488_v13 }
 0x1a8   :  { %v613_v14 = vpop.eup %612 }
 0x1a9   :  { %v490_v15 = vadd.f32 1.0, %v613_v14 }
 0x1ab   :  { %620 = vrcp.f32 %v490_v15 }
 0x1ac   :  { %v615_v16 = vpop.eup %614 }
 0x1ad   :  { %v491_v17 = vadd.f32 1.0, %v615_v16 }
 0x1af   :  { %622 = vrcp.f32 %v491_v17 }
 0x1b0   :  { %v617_v18 = vpop.eup %616 }
 0x1b1   :  { %v492_v19 = vadd.f32 1.0, %v617_v18 }
 0x1b3   :  { %624 = vrcp.f32 %v492_v19 }
 0x1b4   :  { %v619_v20 = vpop.eup %618 }
 0x1b5   :  { %v493_v21 = vadd.f32 1.0, %v619_v20 }
 0x1b7   :  { %626 = vrcp.f32 %v493_v21 }
 0x1b8   :  { %v621_v22 = vpop.eup %620 }
 0x1b9   :  { %503 = vst.msk [vmem:[%s941_s4] sm:$0xff] %vm502_vm2, %v621_v22 }
 0x1bc   :  { %v623_v23 = vpop.eup %622 }
 0x1bd   :  { %504 = vst.msk [vmem:[%s941_s4 + $0x8] sm:$0xff] %vm502_vm2, %v623_v23 }
 0x1c0   :  { %v625_v24 = vpop.eup %624 }
 0x1c1   :  { %505 = vst.msk [vmem:[%s941_s4 + $0x10] sm:$0xff] %vm502_vm2, %v625_v24 }
 0x1c4   :  { %v627_v25 = vpop.eup %626 }
 0x1c5   :  { %506 = vst.msk [vmem:[%s941_s4 + $0x18] sm:$0xff] %vm502_vm2, %v627_v25 }

</bundles_post_ra>
